<compile_context>
chip_gen: v7x
topology: tpu7x:2x2x1
jax: 0.10.0
libtpu: 0.0.40
codegen_flags: <defaults>
</compile_context>

<pallas_src>
import numpy as np
import jax
import jax.numpy as jnp
from jax import lax
from jax.experimental import pallas as pl
from jax.experimental.pallas import tpu as pltpu


# ---------------------------------------------------------------------------
# Kernel
# ---------------------------------------------------------------------------
def resblock_kernel(x_ref, m1_ref, b1_ref, m2_ref, b2_ref,
                    fc1w_ref, fc1b_ref, fc2w_ref, fc2b_ref, out_ref):
    # x_ref   : (bm, H, WC)   lane-dense input block (bm batch elements)
    # m1/m2   : (3*WC, WC)    ky-stacked banded conv matrices
    # b1/b2   : (1, WC)       conv biases tiled to the lane pattern
    # fc1w    : (WC, SE)      fc1 weight with 1/(H*W) pooling folded in
    # fc1b    : (1, SE)
    # fc2w    : (SE, 2*WC)    fc2 gate+bias halves fused, lane-tiled
    # fc2b    : (1, 2*WC)
    # out_ref : (bm, H, WC)
    bm, H, WC = out_ref.shape
    M = bm * H
    x3 = x_ref[...]                       # (bm, H, WC)
    x = x3.reshape(M, WC)                 # batch folded into the MXU M dimension

    # Rows that must NOT receive a neighbor from the adjacent image (batch boundaries)
    # and the zero-padding halo at the top/bottom of each image.
    row = lax.broadcasted_iota(jnp.int32, (M, WC), 0)
    not_first = (row % H) != 0            # may take a value from the row above
    not_last = (row % H) != (H - 1)       # may take a value from the row below

    def conv3x3(z, m_ref, b_ref):
        # ky halo via XLU roll + VPU mask; kx halo is baked into the banded matrix.
        z_dn = jnp.where(not_first, pltpu.roll(z, 1, axis=0), 0.0)      # row h -> z[h-1]
        z_up = jnp.where(not_last, pltpu.roll(z, M - 1, axis=0), 0.0)   # row h -> z[h+1]
        z_cat = jnp.concatenate([z_dn, z, z_up], axis=1)                # (M, 3*WC), lane concat
        acc = jnp.dot(z_cat, m_ref[...], preferred_element_type=jnp.float32)
        return jnp.maximum(acc + b_ref[...], 0.0)

    y1 = conv3x3(x, m1_ref, b1_ref)       # conv1 + relu
    y2 = conv3x3(y1, m2_ref, b2_ref)      # conv2 + relu

    # ---- SE layer ----
    # Per-image global average pool: column-sum over each image's H rows here; the
    # 1/(H*W) factor and the per-channel gather over the W*C lane pattern are folded
    # into fc1w on the host.
    y2_3 = y2.reshape(bm, H, WC)
    pooled = jnp.sum(y2_3, axis=1)                                       # (bm, WC)   XLU
    s1 = jnp.dot(pooled, fc1w_ref[...], preferred_element_type=jnp.float32)
    s1 = jnp.maximum(s1 + fc1b_ref[...], 0.0)                            # (bm, SE)
    s2 = jnp.dot(s1, fc2w_ref[...], preferred_element_type=jnp.float32)
    s2 = s2 + fc2b_ref[...]                                              # (bm, 2*WC)
    gate = jax.nn.sigmoid(s2[:, :WC])                                    # (bm, WC)   EUP
    se_bias = s2[:, WC:]                                                 # (bm, WC)
    se = y2_3 * gate[:, None, :] + se_bias[:, None, :]                   # row broadcast per image

    # ---- residual add + relu (lane-dense, unmasked store) ----
    out_ref[...] = jnp.maximum(se + x3, 0.0)


# ---------------------------------------------------------------------------
# Host-side parameter packing (run ONCE per block, not per call)
# ---------------------------------------------------------------------------
def _build_conv_band_stacked(w_torch, W):
    """Stacked banded matrix of shape (3*W*Cin, W*Cout) from a torch-layout conv weight
    (Cout, Cin, 3, 3):  rows are [M_ky0; M_ky1; M_ky2] with
    M_ky[(w+kx-1)*Cin + ci, w*Cout + co] = w[co, ci, ky, kx]
    (columns with w+kx-1 out of range are dropped -- the padded input there is zero)."""
    wt = np.asarray(w_torch)
    Cout, Cin, KH, KW = wt.shape
    mats = np.zeros((KH, W * Cin, W * Cout), np.float32)
    for ky in range(KH):
        for kx in range(KW):
            blk = wt[:, :, ky, kx].T                       # (Cin, Cout)
            for w in range(W):
                wi = w + kx - 1
                if 0 <= wi < W:
                    mats[ky, wi * Cin:(wi + 1) * Cin, w * Cout:(w + 1) * Cout] = blk
    return jnp.asarray(mats.reshape(KH * W * Cin, W * Cout))


def pack_params(tp, H, W):
    """Turn torch-layout parameters into the lane-dense operands the kernel consumes."""
    C = np.asarray(tp["conv1_w"]).shape[0]
    m1 = _build_conv_band_stacked(tp["conv1_w"], W)                      # (3*WC, WC)
    m2 = _build_conv_band_stacked(tp["conv2_w"], W)
    b1 = jnp.asarray(np.tile(np.asarray(tp["conv1_b"]), W)[None])        # (1, WC)
    b2 = jnp.asarray(np.tile(np.asarray(tp["conv2_b"]), W)[None])

    fc1_w = np.asarray(tp["fc1_w"])                                      # (SE, C)
    fc1w_eff = np.tile(fc1_w.T / float(H * W), (W, 1)).astype(np.float32)  # (WC, SE)
    fc1b = np.asarray(tp["fc1_b"]).astype(np.float32)[None]              # (1, SE)

    fc2_w = np.asarray(tp["fc2_w"])                                      # (2C, SE)
    fc2_b = np.asarray(tp["fc2_b"])                                      # (2C,)
    fc2w_cat = np.concatenate([np.tile(fc2_w[:C, :].T, (1, W)),
                               np.tile(fc2_w[C:, :].T, (1, W))], axis=1).astype(np.float32)
    fc2b_cat = np.concatenate([np.tile(fc2_b[:C], W),
                               np.tile(fc2_b[C:], W)]).astype(np.float32)[None]

    return dict(m1=m1, b1=b1, m2=m2, b2=b2,
                fc1w=jnp.asarray(fc1w_eff), fc1b=jnp.asarray(fc1b),
                fc2w=jnp.asarray(fc2w_cat), fc2b=jnp.asarray(fc2b_cat))


# ---------------------------------------------------------------------------
# Wrappers
# ---------------------------------------------------------------------------
def residual_block_lane(x_lane, kp, bm=None):
    """x_lane: (B, H, W*C) float32 lane-dense activations. Returns same shape.
    bm = batch elements per grid step.  Default bm=B (single step; best on single-core
    v5e/v6e).  Use bm=1 on v7x so the two TensorCores each take a batch element."""
    B, H, WC = x_lane.shape
    assert WC % 128 == 0 and H % 8 == 0, "lane-dense layout needs W*C % 128 == 0, H % 8 == 0"
    if bm is None:
        bm = B
    assert B % bm == 0
    nb = B // bm
    SE = kp["fc1b"].shape[1]

    return pl.pallas_call(
        resblock_kernel,
        out_shape=jax.ShapeDtypeStruct((B, H, WC), jnp.float32),
        grid_spec=pltpu.PrefetchScalarGridSpec(
            num_scalar_prefetch=0,
            grid=(nb,),
            in_specs=[
                pl.BlockSpec((bm, H, WC), lambda b: (b, 0, 0)),       # x
                pl.BlockSpec((3 * WC, WC), lambda b: (0, 0)),         # conv1 bands (stacked)
                pl.BlockSpec((1, WC), lambda b: (0, 0)),              # conv1 bias
                pl.BlockSpec((3 * WC, WC), lambda b: (0, 0)),         # conv2 bands (stacked)
                pl.BlockSpec((1, WC), lambda b: (0, 0)),              # conv2 bias
                pl.BlockSpec((WC, SE), lambda b: (0, 0)),             # fc1 (pool folded in)
                pl.BlockSpec((1, SE), lambda b: (0, 0)),              # fc1 bias
                pl.BlockSpec((SE, 2 * WC), lambda b: (0, 0)),         # fc2 gate+bias fused
                pl.BlockSpec((1, 2 * WC), lambda b: (0, 0)),          # fc2 bias fused
            ],
            out_specs=pl.BlockSpec((bm, H, WC), lambda b: (b, 0, 0)),
        ),
        compiler_params=pltpu.CompilerParams(
            dimension_semantics=("parallel",)),
    )(x_lane, kp["m1"], kp["b1"], kp["m2"], kp["b2"],
      kp["fc1w"], kp["fc1b"], kp["fc2w"], kp["fc2b"])


def to_lane(x_nchw):
    B, C, H, W = x_nchw.shape
    return jnp.transpose(x_nchw, (0, 2, 3, 1)).reshape(B, H, W * C)


def from_lane(x_lane, C):
    B, H, WC = x_lane.shape
    return jnp.transpose(x_lane.reshape(B, H, WC // C, C), (0, 3, 1, 2))


def residual_block_pallas(x_nchw, packed_params, bm=None):
    """Convenience NCHW wrapper (stacked towers should stay lane-dense between blocks)."""
    C = x_nchw.shape[1]
    return from_lane(residual_block_lane(to_lane(x_nchw), packed_params, bm=bm), C)


# ---------------------------------------------------------------------------
# Pure-JAX reference (from the torch-layout parameters)
# ---------------------------------------------------------------------------
def residual_block_ref(x_nchw, tp):
    C = x_nchw.shape[1]
    x = jnp.transpose(x_nchw, (0, 2, 3, 1))                              # NHWC
    dn = ("NHWC", "HWIO", "NHWC")
    w1 = jnp.transpose(tp["conv1_w"], (2, 3, 1, 0))
    w2 = jnp.transpose(tp["conv2_w"], (2, 3, 1, 0))
    out = lax.conv_general_dilated(x, w1, (1, 1), ((1, 1), (1, 1)), dimension_numbers=dn)
    out = jnp.maximum(out + tp["conv1_b"], 0.0)
    out = lax.conv_general_dilated(out, w2, (1, 1), ((1, 1), (1, 1)), dimension_numbers=dn)
    out = jnp.maximum(out + tp["conv2_b"], 0.0)
    pooled = jnp.mean(out, axis=(1, 2))                                  # (B, C)
    s1 = jnp.maximum(pooled @ tp["fc1_w"].T + tp["fc1_b"], 0.0)
    s2 = s1 @ tp["fc2_w"].T + tp["fc2_b"]
    gate = jax.nn.sigmoid(s2[:, :C])[:, None, None, :]
    bias = s2[:, C:][:, None, None, :]
    out = out * gate + bias
    out = jnp.maximum(out + x, 0.0)
    return jnp.transpose(out, (0, 3, 1, 2))


def make_params(filters, se_channels, key):
    """Deterministic synthetic parameters in native PyTorch layouts:
    conv: (Cout, Cin, 3, 3) + (Cout,), linear: (out, in) + (out,)."""
    ks = jax.random.split(key, 8)
    return dict(
        conv1_w=jax.random.normal(ks[0], (filters, filters, 3, 3), jnp.float32) * 0.1,
        conv1_b=jax.random.normal(ks[1], (filters,), jnp.float32) * 0.05,
        conv2_w=jax.random.normal(ks[2], (filters, filters, 3, 3), jnp.float32) * 0.1,
        conv2_b=jax.random.normal(ks[3], (filters,), jnp.float32) * 0.05,
        fc1_w=jax.random.normal(ks[4], (se_channels, filters), jnp.float32) * 0.1,
        fc1_b=jax.random.normal(ks[5], (se_channels,), jnp.float32) * 0.05,
        fc2_w=jax.random.normal(ks[6], (2 * filters, se_channels), jnp.float32) * 0.1,
        fc2_b=jax.random.normal(ks[7], (2 * filters,), jnp.float32) * 0.05,
    )


if __name__ == "__main__":
    B, filters, H, W = 2, 8, 16, 16        # W * filters = 128 -> lane-dense layout
    se_channels = 4

    x = jax.random.normal(jax.random.PRNGKey(0), (B, filters, H, W), jnp.float32)
    params = make_params(filters, se_channels, jax.random.PRNGKey(1))

    packed = pack_params(params, H, W)     # host-side packing: done once, reused per call

    out = residual_block_pallas(x, packed)
    out = jax.block_until_ready(out)

    ref = residual_block_ref(x, params)
    assert out.shape == (B, filters, H, W)
    err = float(jnp.max(jnp.abs(out - ref)))
    assert err < 2e-4, err

    print("KERNEL_OK")
</pallas_src>

<mosaic_0001>
module attributes {stable_mosaic.version = 11 : i64} {
  func.func @resblock_kernel(%arg0: i32, %arg1: memref<2x16x128xf32, #tpu.memory_space<vmem>>, %arg2: memref<384x128xf32, #tpu.memory_space<vmem>>, %arg3: memref<1x128xf32, #tpu.memory_space<vmem>>, %arg4: memref<384x128xf32, #tpu.memory_space<vmem>>, %arg5: memref<1x128xf32, #tpu.memory_space<vmem>>, %arg6: memref<128x4xf32, #tpu.memory_space<vmem>>, %arg7: memref<1x4xf32, #tpu.memory_space<vmem>>, %arg8: memref<4x256xf32, #tpu.memory_space<vmem>>, %arg9: memref<1x256xf32, #tpu.memory_space<vmem>>, %arg10: memref<2x16x128xf32, #tpu.memory_space<vmem>>) attributes {dimension_semantics = [#tpu.dimension_semantics<parallel>], iteration_bounds = array<i64: 1>, scalar_prefetch = 0 : i64, scratch_operands = 0 : i64, tpu.core_type = #tpu.core_type<tc>, window_params = [{transform_indices = @transform_0, window_bounds = array<i64: 2, 16, 128>}, {pipeline_mode = #tpu.pipeline_mode<synchronous>, transform_indices = @transform_1, window_bounds = array<i64: 384, 128>}, {pipeline_mode = #tpu.pipeline_mode<synchronous>, transform_indices = @transform_2, window_bounds = array<i64: 1, 128>}, {pipeline_mode = #tpu.pipeline_mode<synchronous>, transform_indices = @transform_3, window_bounds = array<i64: 384, 128>}, {pipeline_mode = #tpu.pipeline_mode<synchronous>, transform_indices = @transform_4, window_bounds = array<i64: 1, 128>}, {pipeline_mode = #tpu.pipeline_mode<synchronous>, transform_indices = @transform_5, window_bounds = array<i64: 128, 4>}, {pipeline_mode = #tpu.pipeline_mode<synchronous>, transform_indices = @transform_6, window_bounds = array<i64: 1, 4>}, {pipeline_mode = #tpu.pipeline_mode<synchronous>, transform_indices = @transform_7, window_bounds = array<i64: 4, 256>}, {pipeline_mode = #tpu.pipeline_mode<synchronous>, transform_indices = @transform_8, window_bounds = array<i64: 1, 256>}, {transform_indices = @transform_9, window_bounds = array<i64: 2, 16, 128>}]} {
    %c0 = arith.constant 0 : index
    %c0_0 = arith.constant 0 : index
    %c0_1 = arith.constant 0 : index
    %0 = vector.load %arg1[%c0, %c0_0, %c0_1] : memref<2x16x128xf32, #tpu.memory_space<vmem>>, vector<2x16x128xf32>
    %1 = vector.shape_cast %0 : vector<2x16x128xf32> to vector<32x128xf32>
    %2 = tpu.iota {dimensions = array<i32: 0>} : vector<32x128xi32>
    %c16_i32 = arith.constant 16 : i32
    %c0_i32 = arith.constant 0 : i32
    %3 = arith.cmpi eq, %c16_i32, %c0_i32 : i32
    %c1_i32 = arith.constant 1 : i32
    %4 = arith.select %3, %c1_i32, %c16_i32 : i32
    %5 = vector.broadcast %4 : i32 to vector<32x128xi32>
    %6 = arith.remsi %2, %5 : vector<32x128xi32>
    %c0_i32_2 = arith.constant 0 : i32
    %7 = vector.broadcast %c0_i32_2 : i32 to vector<32x128xi32>
    %8 = arith.cmpi ne, %6, %7 : vector<32x128xi32>
    %c0_i32_3 = arith.constant 0 : i32
    %9 = vector.broadcast %c0_i32_3 : i32 to vector<32x128xi32>
    %10 = arith.cmpi slt, %6, %9 : vector<32x128xi32>
    %c0_i32_4 = arith.constant 0 : i32
    %11 = arith.cmpi slt, %4, %c0_i32_4 : i32
    %12 = vector.broadcast %11 : i1 to vector<32x128xi1>
    %13 = vector.broadcast %12 : vector<32x128xi1> to vector<32x128xi1>
    %14 = arith.xori %10, %13 : vector<32x128xi1>
    %15 = arith.andi %14, %8 : vector<32x128xi1>
    %16 = vector.broadcast %4 : i32 to vector<32x128xi32>
    %17 = arith.addi %6, %16 : vector<32x128xi32>
    %18 = arith.select %15, %17, %6 : vector<32x128xi1>, vector<32x128xi32>
    %c0_i32_5 = arith.constant 0 : i32
    %19 = vector.broadcast %c0_i32_5 : i32 to vector<32x128xi32>
    %20 = arith.cmpi ne, %18, %19 : vector<32x128xi32>
    %c16_i32_6 = arith.constant 16 : i32
    %c0_i32_7 = arith.constant 0 : i32
    %21 = arith.cmpi eq, %c16_i32_6, %c0_i32_7 : i32
    %c1_i32_8 = arith.constant 1 : i32
    %22 = arith.select %21, %c1_i32_8, %c16_i32_6 : i32
    %23 = vector.broadcast %22 : i32 to vector<32x128xi32>
    %24 = arith.remsi %2, %23 : vector<32x128xi32>
    %c0_i32_9 = arith.constant 0 : i32
    %25 = vector.broadcast %c0_i32_9 : i32 to vector<32x128xi32>
    %26 = arith.cmpi ne, %24, %25 : vector<32x128xi32>
    %c0_i32_10 = arith.constant 0 : i32
    %27 = vector.broadcast %c0_i32_10 : i32 to vector<32x128xi32>
    %28 = arith.cmpi slt, %24, %27 : vector<32x128xi32>
    %c0_i32_11 = arith.constant 0 : i32
    %29 = arith.cmpi slt, %22, %c0_i32_11 : i32
    %30 = vector.broadcast %29 : i1 to vector<32x128xi1>
    %31 = vector.broadcast %30 : vector<32x128xi1> to vector<32x128xi1>
    %32 = arith.xori %28, %31 : vector<32x128xi1>
    %33 = arith.andi %32, %26 : vector<32x128xi1>
    %34 = vector.broadcast %22 : i32 to vector<32x128xi32>
    %35 = arith.addi %24, %34 : vector<32x128xi32>
    %36 = arith.select %33, %35, %24 : vector<32x128xi1>, vector<32x128xi32>
    %c15_i32 = arith.constant 15 : i32
    %37 = vector.broadcast %c15_i32 : i32 to vector<32x128xi32>
    %38 = arith.cmpi ne, %36, %37 : vector<32x128xi32>
    %c1_i32_12 = arith.constant 1 : i32
    %39 = tpu.dynamic_rotate %1 by %c1_i32_12 dim 0 : vector<32x128xf32>, i32 -> vector<32x128xf32>
    %cst = arith.constant 0.000000e+00 : f32
    %40 = vector.broadcast %cst : f32 to vector<32x128xf32>
    %41 = arith.select %20, %39, %40 : vector<32x128xi1>, vector<32x128xf32>
    %c31_i32 = arith.constant 31 : i32
    %42 = tpu.dynamic_rotate %1 by %c31_i32 dim 0 : vector<32x128xf32>, i32 -> vector<32x128xf32>
    %cst_13 = arith.constant 0.000000e+00 : f32
    %43 = vector.broadcast %cst_13 : f32 to vector<32x128xf32>
    %44 = arith.select %38, %42, %43 : vector<32x128xi1>, vector<32x128xf32>
    %45 = tpu.concatenate %41, %1, %44 in 1 : vector<32x128xf32>, vector<32x128xf32>, vector<32x128xf32> -> vector<32x384xf32>
    %c0_14 = arith.constant 0 : index
    %c0_15 = arith.constant 0 : index
    %46 = vector.load %arg2[%c0_14, %c0_15] : memref<384x128xf32, #tpu.memory_space<vmem>>, vector<384x128xf32>
    %cst_16 = arith.constant dense<0.000000e+00> : vector<32x128xf32>
    %47 = tpu.matmul %45, %46, %cst_16 {dimension_numbers = #tpu.dot_dimension_numbers<[1], [0], [0], [1], [0, 0, 1, 1], [], []>} : vector<32x384xf32>, vector<384x128xf32>, vector<32x128xf32> -> vector<32x128xf32>
    %c0_17 = arith.constant 0 : index
    %c0_18 = arith.constant 0 : index
    %48 = vector.load %arg3[%c0_17, %c0_18] : memref<1x128xf32, #tpu.memory_space<vmem>>, vector<1x128xf32>
    %49 = vector.broadcast %48 : vector<1x128xf32> to vector<32x128xf32>
    %50 = arith.addf %47, %49 : vector<32x128xf32>
    %cst_19 = arith.constant 0.000000e+00 : f32
    %51 = vector.broadcast %cst_19 : f32 to vector<32x128xf32>
    %52 = arith.maximumf %50, %51 : vector<32x128xf32>
    %c1_i32_20 = arith.constant 1 : i32
    %53 = tpu.dynamic_rotate %52 by %c1_i32_20 dim 0 : vector<32x128xf32>, i32 -> vector<32x128xf32>
    %cst_21 = arith.constant 0.000000e+00 : f32
    %54 = vector.broadcast %cst_21 : f32 to vector<32x128xf32>
    %55 = arith.select %20, %53, %54 : vector<32x128xi1>, vector<32x128xf32>
    %c31_i32_22 = arith.constant 31 : i32
    %56 = tpu.dynamic_rotate %52 by %c31_i32_22 dim 0 : vector<32x128xf32>, i32 -> vector<32x128xf32>
    %cst_23 = arith.constant 0.000000e+00 : f32
    %57 = vector.broadcast %cst_23 : f32 to vector<32x128xf32>
    %58 = arith.select %38, %56, %57 : vector<32x128xi1>, vector<32x128xf32>
    %59 = tpu.concatenate %55, %52, %58 in 1 : vector<32x128xf32>, vector<32x128xf32>, vector<32x128xf32> -> vector<32x384xf32>
    %c0_24 = arith.constant 0 : index
    %c0_25 = arith.constant 0 : index
    %60 = vector.load %arg4[%c0_24, %c0_25] : memref<384x128xf32, #tpu.memory_space<vmem>>, vector<384x128xf32>
    %cst_26 = arith.constant dense<0.000000e+00> : vector<32x128xf32>
    %61 = tpu.matmul %59, %60, %cst_26 {dimension_numbers = #tpu.dot_dimension_numbers<[1], [0], [0], [1], [0, 0, 1, 1], [], []>} : vector<32x384xf32>, vector<384x128xf32>, vector<32x128xf32> -> vector<32x128xf32>
    %c0_27 = arith.constant 0 : index
    %c0_28 = arith.constant 0 : index
    %62 = vector.load %arg5[%c0_27, %c0_28] : memref<1x128xf32, #tpu.memory_space<vmem>>, vector<1x128xf32>
    %63 = vector.broadcast %62 : vector<1x128xf32> to vector<32x128xf32>
    %64 = arith.addf %61, %63 : vector<32x128xf32>
    %cst_29 = arith.constant 0.000000e+00 : f32
    %65 = vector.broadcast %cst_29 : f32 to vector<32x128xf32>
    %66 = arith.maximumf %64, %65 : vector<32x128xf32>
    %67 = vector.shape_cast %66 : vector<32x128xf32> to vector<2x16x128xf32>
    %cst_30 = arith.constant dense<0.000000e+00> : vector<2x128xf32>
    %68 = vector.multi_reduction <add>, %67, %cst_30 [1] : vector<2x16x128xf32> to vector<2x128xf32>
    %c0_31 = arith.constant 0 : index
    %c0_32 = arith.constant 0 : index
    %69 = vector.load %arg6[%c0_31, %c0_32] : memref<128x4xf32, #tpu.memory_space<vmem>>, vector<128x4xf32>
    %cst_33 = arith.constant dense<0.000000e+00> : vector<2x4xf32>
    %70 = tpu.matmul %68, %69, %cst_33 {dimension_numbers = #tpu.dot_dimension_numbers<[1], [0], [0], [1], [0, 0, 1, 1], [], []>} : vector<2x128xf32>, vector<128x4xf32>, vector<2x4xf32> -> vector<2x4xf32>
    %c0_34 = arith.constant 0 : index
    %c0_35 = arith.constant 0 : index
    %71 = vector.load %arg7[%c0_34, %c0_35] : memref<1x4xf32, #tpu.memory_space<vmem>>, vector<1x4xf32>
    %72 = vector.broadcast %71 : vector<1x4xf32> to vector<2x4xf32>
    %73 = arith.addf %70, %72 : vector<2x4xf32>
    %cst_36 = arith.constant 0.000000e+00 : f32
    %74 = vector.broadcast %cst_36 : f32 to vector<2x4xf32>
    %75 = arith.maximumf %73, %74 : vector<2x4xf32>
    %c0_37 = arith.constant 0 : index
    %c0_38 = arith.constant 0 : index
    %76 = vector.load %arg8[%c0_37, %c0_38] : memref<4x256xf32, #tpu.memory_space<vmem>>, vector<4x256xf32>
    %cst_39 = arith.constant dense<0.000000e+00> : vector<2x256xf32>
    %77 = tpu.matmul %75, %76, %cst_39 {dimension_numbers = #tpu.dot_dimension_numbers<[1], [0], [0], [1], [0, 0, 1, 1], [], []>} : vector<2x4xf32>, vector<4x256xf32>, vector<2x256xf32> -> vector<2x256xf32>
    %c0_40 = arith.constant 0 : index
    %c0_41 = arith.constant 0 : index
    %78 = vector.load %arg9[%c0_40, %c0_41] : memref<1x256xf32, #tpu.memory_space<vmem>>, vector<1x256xf32>
    %79 = vector.broadcast %78 : vector<1x256xf32> to vector<2x256xf32>
    %80 = arith.addf %77, %79 : vector<2x256xf32>
    %81 = vector.extract_strided_slice %80 {offsets = [0, 0], sizes = [2, 128], strides = [1, 1]} : vector<2x256xf32> to vector<2x128xf32>
    %82 = arith.negf %81 : vector<2x128xf32>
    %83 = math.exp %82 : vector<2x128xf32>
    %cst_42 = arith.constant 1.000000e+00 : f32
    %84 = vector.broadcast %cst_42 : f32 to vector<2x128xf32>
    %85 = arith.addf %84, %83 : vector<2x128xf32>
    %86 = arith.divf %84, %85 : vector<2x128xf32>
    %87 = vector.extract_strided_slice %80 {offsets = [0, 128], sizes = [2, 128], strides = [1, 1]} : vector<2x256xf32> to vector<2x128xf32>
    %88 = vector.shape_cast %86 : vector<2x128xf32> to vector<2x1x128xf32>
    %89 = vector.broadcast %88 : vector<2x1x128xf32> to vector<2x16x128xf32>
    %90 = arith.mulf %67, %89 : vector<2x16x128xf32>
    %91 = vector.shape_cast %87 : vector<2x128xf32> to vector<2x1x128xf32>
    %92 = vector.broadcast %91 : vector<2x1x128xf32> to vector<2x16x128xf32>
    %93 = arith.addf %90, %92 : vector<2x16x128xf32>
    %94 = arith.addf %93, %0 : vector<2x16x128xf32>
    %cst_43 = arith.constant 0.000000e+00 : f32
    %95 = vector.broadcast %cst_43 : f32 to vector<2x16x128xf32>
    %96 = arith.maximumf %94, %95 : vector<2x16x128xf32>
    %c0_44 = arith.constant 0 : index
    %c0_45 = arith.constant 0 : index
    %c0_46 = arith.constant 0 : index
    %97 = vector.load %arg10[%c0_44, %c0_45, %c0_46] : memref<2x16x128xf32, #tpu.memory_space<vmem>>, vector<2x16x128xf32>
    tpu.vector_store %arg10[%c0_44, %c0_45, %c0_46], %96 {strides = array<i32>} : memref<2x16x128xf32, #tpu.memory_space<vmem>>, vector<2x16x128xf32>,
    return
  }
  func.func @transform_0(%arg0: i32) -> (i32, i32, i32) {
    %c0_i32 = arith.constant 0 : i32
    %c0_i32_0 = arith.constant 0 : i32
    %c0_i32_1 = arith.constant 0 : i32
    return %arg0, %c0_i32, %c0_i32_0 : i32, i32, i32
  }
  func.func @transform_1(%arg0: i32) -> (i32, i32) {
    %c0_i32 = arith.constant 0 : i32
    %c0_i32_0 = arith.constant 0 : i32
    %c0_i32_1 = arith.constant 0 : i32
    return %c0_i32, %c0_i32_0 : i32, i32
  }
  func.func @transform_2(%arg0: i32) -> (i32, i32) {
    %c0_i32 = arith.constant 0 : i32
    %c0_i32_0 = arith.constant 0 : i32
    %c0_i32_1 = arith.constant 0 : i32
    return %c0_i32, %c0_i32_0 : i32, i32
  }
  func.func @transform_3(%arg0: i32) -> (i32, i32) {
    %c0_i32 = arith.constant 0 : i32
    %c0_i32_0 = arith.constant 0 : i32
    %c0_i32_1 = arith.constant 0 : i32
    return %c0_i32, %c0_i32_0 : i32, i32
  }
  func.func @transform_4(%arg0: i32) -> (i32, i32) {
    %c0_i32 = arith.constant 0 : i32
    %c0_i32_0 = arith.constant 0 : i32
    %c0_i32_1 = arith.constant 0 : i32
    return %c0_i32, %c0_i32_0 : i32, i32
  }
  func.func @transform_5(%arg0: i32) -> (i32, i32) {
    %c0_i32 = arith.constant 0 : i32
    %c0_i32_0 = arith.constant 0 : i32
    %c0_i32_1 = arith.constant 0 : i32
    return %c0_i32, %c0_i32_0 : i32, i32
  }
  func.func @transform_6(%arg0: i32) -> (i32, i32) {
    %c0_i32 = arith.constant 0 : i32
    %c0_i32_0 = arith.constant 0 : i32
    %c0_i32_1 = arith.constant 0 : i32
    return %c0_i32, %c0_i32_0 : i32, i32
  }
  func.func @transform_7(%arg0: i32) -> (i32, i32) {
    %c0_i32 = arith.constant 0 : i32
    %c0_i32_0 = arith.constant 0 : i32
    %c0_i32_1 = arith.constant 0 : i32
    return %c0_i32, %c0_i32_0 : i32, i32
  }
  func.func @transform_8(%arg0: i32) -> (i32, i32) {
    %c0_i32 = arith.constant 0 : i32
    %c0_i32_0 = arith.constant 0 : i32
    %c0_i32_1 = arith.constant 0 : i32
    return %c0_i32, %c0_i32_0 : i32, i32
  }
  func.func @transform_9(%arg0: i32) -> (i32, i32, i32) {
    %c0_i32 = arith.constant 0 : i32
    %c0_i32_0 = arith.constant 0 : i32
    %c0_i32_1 = arith.constant 0 : i32
    return %arg0, %c0_i32, %c0_i32_0 : i32, i32, i32
  }
}

</mosaic_0001>

<bundles_post_ra>
// kernel: tpu_custom_call.1
= control target key start
LH: loop header
LB: loop body
LE: loop exit
PB: predicated region body
PF: predicated region fallthrough
CT: control target
= control target key end

     0   :  { %14 = vsyncpa [#allocation3], 0  ;;  %s1768_s0 = inlined_call_operand.vmem [shape: f32[2,16,128], index: 0, kind: input, shape index: {}]   ;;  %s1769_s1 = inlined_call_operand.hbm [shape: f32[384,128], index: 1, kind: input, shape index: {}]   ;;  %s1770_s2 = inlined_call_operand.vmem [shape: f32[1,128], index: 2, kind: input, shape index: {}]   ;;  %s1771_s3 = inlined_call_operand.hbm [shape: f32[384,128], index: 3, kind: input, shape index: {}]   ;;  %s1772_s4 = inlined_call_operand.vmem [shape: f32[1,128], index: 4, kind: input, shape index: {}]   ;;  %s1773_s5 = inlined_call_operand.vmem [shape: f32[128,4], index: 5, kind: input, shape index: {}]   ;;  %s1774_s6 = inlined_call_operand.vmem [shape: f32[1,4], index: 6, kind: input, shape index: {}]   ;;  %s1775_s7 = inlined_call_operand.vmem [shape: f32[4,256], index: 7, kind: input, shape index: {}]   ;;  %s1776_s8 = inlined_call_operand.vmem [shape: f32[1,256], index: 8, kind: input, shape index: {}]   ;;  %s1777_s9 = inlined_call_operand.hbm [shape: f32[2,16,128], index: 9, kind: output, shape index: {}]  }
   0x1   :  { %15 = vsyncpa [#allocation6], 0 }
   0x2   :  { %16 = vsyncpa [#allocation4], 0  ;;  %s1461_s30 = smov [#allocation2]   ;;  %s1389_s13 = scalar_lea.hbm %s1769_s1, 6144 }
   0x3   :  { %s24_s10 = sshll.u32 %s1461_s30, 4  ;;  %p1390_p0 = scmp.ne.s32.totalorder %s1769_s1, %s1389_s13  ;;  %s25_s10 = int_to_ptr.vmem [resolvable:$true] %s24_s10 }
   0x4   :  { %p1393_p1 = scmp.lt.u32.totalorder %s1389_s13, %s1769_s1 }
   0x6   :  { %p1395_p2 = pnand %p1393_p1, %p1390_p0 }
   0x8   :  { %1398 = shalt.err (!%p1395_p2)
}
   0x9   :  { %s1399_s18 = scalar_lea.vmem %s25_s10, 6144  ;;  %p1404_p4 = scmp.lt.s32.totalorder %s25_s10, %s25_s10 }
   0xa   :  { %p1400_p3 = scmp.ne.s32.totalorder %s25_s10, %s1399_s18  ;;  %p1405_p5 = scmp.lt.s32.totalorder %s1399_s18, %s1399_s18 }
   0xc   :  { %p1406_p6 = por %p1405_p5, %p1404_p4 }
   0xe   :  { %p1407_p7 = pnand %p1406_p6, %p1400_p3 }
  0x10   :  { %1410 = shalt.err (!%p1407_p7)
}
  0x11   :  { %s1462_s19 = smov 128   ;;  %s1463_s20 = smov 8  }
  0x12   :  { %30 = dma.hbm_to_vmem [thread:$0]  %s1769_s1, 6144, %s25_s10, [#allocation3], %s1462_s19, %s1462_s19, %s1463_s20  }
  0x13   :  { %s1464_s23 = smov [#allocation5]   ;;  %s1411_s27 = scalar_lea.hbm %s1771_s3, 6144 }
  0x14   :  { %s38_s24 = sshll.u32 %s1464_s23, 4  ;;  %p1412_p8 = scmp.ne.s32.totalorder %s1771_s3, %s1411_s27  ;;  %s39_s24 = int_to_ptr.vmem [resolvable:$true] %s38_s24 }
  0x15   :  { %p1415_p9 = scmp.lt.u32.totalorder %s1411_s27, %s1771_s3 }
  0x17   :  { %p1417_p10 = pnand %p1415_p9, %p1412_p8 }
  0x19   :  { %1420 = shalt.err (!%p1417_p10)
}
  0x1a   :  { %s1421_s12 = scalar_lea.vmem %s39_s24, 6144  ;;  %p1426_p12 = scmp.lt.s32.totalorder %s39_s24, %s39_s24 }
  0x1b   :  { %p1422_p11 = scmp.ne.s32.totalorder %s39_s24, %s1421_s12  ;;  %p1427_p13 = scmp.lt.s32.totalorder %s1421_s12, %s1421_s12 }
  0x1d   :  { %p1428_p0 = por %p1427_p13, %p1426_p12 }
  0x1f   :  { %p1429_p1 = pnand %p1428_p0, %p1422_p11 }
  0x21   :  { %1432 = shalt.err (!%p1429_p1)
}
  0x22   :  { %44 = dma.hbm_to_vmem [thread:$0]  %s1771_s3, 6144, %s39_s24, [#allocation6], %s1462_s19, %s1462_s19, %s1463_s20  }
  0x23   :  { %1455 = dma.done.wait [#allocation3], 6144  }
  0x24   :  { %1456 = vsyncadd [#allocation3], 4294961152 }
  0x25   :  { %1457 = dma.done.wait [#allocation6], 6144  }
  0x26   :  { %1458 = vsyncadd [#allocation6], 4294961152  ;;  %v168_v0 = vld [vmem:[#allocation2 + $0x80] sm:$0xff]  ;;  %v169_v1 = vld [vmem:[#allocation2 + $0x88] sm:$0xff]  ;;  %v65_v36 = vlaneseq  ;;  %vm1466_vm6 = vmmov 0   ;;  %vm766_vm7 = vcmask 1043456  }
  0x27   :  { %v152_v2 = vld [vmem:[#allocation2] sm:$0xff]  ;;  %v1223_v3 = vpack.c.bf16 %v169_v1, %v168_v0  ;;  %v153_v4 = vld [vmem:[#allocation2 + $0x8] sm:$0xff]  ;;  %v170_v5 = vld [vmem:[#allocation2 + $0x90] sm:$0xff]  ;;  %vm673_vm8 = vcmask 1041409   ;;  %vm762_vm9 = vcmask 31744  }
  0x28   :  { %v171_v6 = vld [vmem:[#allocation2 + $0x98] sm:$0xff]  ;;  %v1225_v7 = vpack.c.bf16 %v153_v4, %v152_v2  ;;  %v184_v9 = vld [vmem:[#allocation2 + $0x100] sm:$0xff]  ;;  %v185_v10 = vld [vmem:[#allocation2 + $0x108] sm:$0xff]  ;;  %v1550_v46 = vshrl.u32 %v65_v36, 7 }
  0x29   :  { %v1227_v8 = vpack.c.bf16 %v171_v6, %v170_v5  ;;  %v154_v11 = vld [vmem:[#allocation2 + $0x10] sm:$0xff]  ;;  %1224 = vmatprep.subr.bf16.mxu0 %v1223_v3  ;;  %v1255_v12 = vpack.c.bf16 %v185_v10, %v184_v9  ;;  %v155_v13 = vld [vmem:[#allocation2 + $0x18] sm:$0xff]  ;;  %v172_v14 = vld [vmem:[#allocation2 + $0xa0] sm:$0xff] }
  0x2a   :  { %v173_v15 = vld [vmem:[#allocation2 + $0xa8] sm:$0xff]  ;;  %1226 = vmatpush3.bf16.msra.mxu0 %v1225_v7  ;;  %v1229_v16 = vpack.c.bf16 %v155_v13, %v154_v11  ;;  %v186_v17 = vld [vmem:[#allocation2 + $0x110] sm:$0xff]  ;;  %v187_v18 = vld [vmem:[#allocation2 + $0x118] sm:$0xff]  ;;  %vm143_vm0 = vcmp.lt.s32.totalorder %v1550_v46, 7  ;;  %vm130_vm1 = vcmp.lt.s32.totalorder %v1550_v46, 1 }
  0x2b   :  { %1228 = vmatprep.subr.bf16.mxu0 %v1227_v8  ;;  %1256 = vmatprep.subr.bf16.mxu1 %v1255_v12  ;;  %v1231_v19 = vpack.c.bf16 %v173_v15, %v172_v14  ;;  %v1259_v20 = vpack.c.bf16 %v187_v18, %v186_v17  ;;  %v156_v21 = vld [vmem:[#allocation2 + $0x20] sm:$0xff]  ;;  %v157_v22 = vld [vmem:[#allocation2 + $0x28] sm:$0xff]  ;;  %v174_v23 = vld [vmem:[#allocation2 + $0xb0] sm:$0xff]  ;;  %v67_v14 = vadd.s32 8, %v1550_v46 }
  0x2c   :  { %1258 = vmatpush3.bf16.msra.mxu1 %v1255_v12  ;;  %v175_v24 = vld [vmem:[#allocation2 + $0xb8] sm:$0xff]  ;;  %v188_v25 = vld [vmem:[#allocation2 + $0x120] sm:$0xff]  ;;  %v189_v26 = vld [vmem:[#allocation2 + $0x128] sm:$0xff]  ;;  %v1233_v28 = vpack.c.bf16 %v157_v22, %v156_v21  ;;  %v74_v21 = vand.u32 15, %v1550_v46 }
  0x2d   :  { %1260 = vmatprep.subr.bf16.mxu1 %v1259_v20  ;;  %v1263_v27 = vpack.c.bf16 %v189_v26, %v188_v25  ;;  %v190_v29 = vld [vmem:[#allocation2 + $0x130] sm:$0xff]  ;;  %v191_v30 = vld [vmem:[#allocation2 + $0x138] sm:$0xff]  ;;  %v1235_v31 = vpack.c.bf16 %v175_v24, %v174_v23  ;;  %v176_v34 = vld [vmem:[#allocation2 + $0xc0] sm:$0xff] }
  0x2e   :  { %1230 = vmatpush3.bf16.msra.mxu0 %v1229_v16  ;;  %v158_v32 = vld [vmem:[#allocation2 + $0x30] sm:$0xff]  ;;  %v159_v33 = vld [vmem:[#allocation2 + $0x38] sm:$0xff]  ;;  %v177_v35 = vld [vmem:[#allocation2 + $0xc8] sm:$0xff]  ;;  %v1267_v37 = vpack.c.bf16 %v191_v30, %v190_v29  ;;  %v69_v30 = vadd.s32 24, %v1550_v46  ;;  %vm1591_vm2 = vcmp.ne.s32.totalorder %v74_v21, 0 }
  0x2f   :  { %1232 = vmatprep.subr.bf16.mxu0 %v1231_v19  ;;  %v1237_v38 = vpack.c.bf16 %v159_v33, %v158_v32  ;;  %v192_v39 = vld [vmem:[#allocation2 + $0x140] sm:$0xff]  ;;  %v193_v40 = vld [vmem:[#allocation2 + $0x148] sm:$0xff]  ;;  %v1239_v41 = vpack.c.bf16 %v177_v35, %v176_v34  ;;  %v178_v44 = vld [vmem:[#allocation2 + $0xd0] sm:$0xff]  ;;  %v68_v33 = vadd.s32 16, %v1550_v46 }
  0x30   :  { %1262 = vmatpush3.bf16.msra.mxu1 %v1259_v20  ;;  %v160_v42 = vld [vmem:[#allocation2 + $0x40] sm:$0xff]  ;;  %v161_v43 = vld [vmem:[#allocation2 + $0x48] sm:$0xff]  ;;  %v179_v45 = vld [vmem:[#allocation2 + $0xd8] sm:$0xff]  ;;  %v1271_v47 = vpack.c.bf16 %v193_v40, %v192_v39 }
  0x31   :  { %1264 = vmatprep.subr.bf16.mxu1 %v1263_v27  ;;  %v1555_v48 = vld [vmem:[%s1768_s0] sm:$0xff]  ;;  %v1241_v49 = vpack.c.bf16 %v161_v43, %v160_v42  ;;  %v194_v50 = vld [vmem:[#allocation2 + $0x150] sm:$0xff]  ;;  %v195_v51 = vld [vmem:[#allocation2 + $0x158] sm:$0xff]  ;;  %v1243_v54 = vpack.c.bf16 %v179_v45, %v178_v44 }
  0x32   :  { %1234 = vmatpush3.bf16.msra.mxu0 %v1233_v28  ;;  %271 = vmatprep.mubr.f32.mxu0 %v1555_v48  ;;  %v1561_v52 = vld [vmem:[%s1768_s0 + $0x8] sm:$0xff]  ;;  %v139_v53 = vrot.slane %v1555_v48, 1  ;;  %v162_v55 = vld [vmem:[#allocation2 + $0x50] sm:$0xff]  ;;  %v163_v56 = vld [vmem:[#allocation2 + $0x58] sm:$0xff]  ;;  %v1275_v60 = vpack.c.bf16 %v195_v51, %v194_v50  ;;  %v126_v20 = vrot.slane %v1555_v48, 7  ;;  %v81_v28 = vand.u32 15, %v67_v14 }
  0x33   :  { %1236 = vmatprep.subr.bf16.mxu0 %v1235_v31  ;;  %v140_v57 = vrot.slane %v1561_v52, 1  ;;  %v180_v58 = vld [vmem:[#allocation2 + $0xe0] sm:$0xff]  ;;  %v181_v59 = vld [vmem:[#allocation2 + $0xe8] sm:$0xff]  ;;  %v1245_v62 = vpack.c.bf16 %v163_v56, %v162_v55  ;;  %v182_v4 = vld [vmem:[#allocation2 + $0xf0] sm:$0xff]  ;;  %v88_v55 = vand.u32 15, %v68_v33 }
  0x34   :  { %1266 = vmatpush3.bf16.msra.mxu1 %v1263_v27  ;;  %v196_v63 = vld [vmem:[#allocation2 + $0x160] sm:$0xff]  ;;  %v197_v0 = vld [vmem:[#allocation2 + $0x168] sm:$0xff]  ;;  %v1247_v1 = vpack.c.bf16 %v181_v59, %v180_v58  ;;  %v183_v5 = vld [vmem:[#allocation2 + $0xf8] sm:$0xff]  ;;  %vm1600_vm3 = vcmp.ne.s32.totalorder %v81_v28, 15 }
  0x35   :  { %1268 = vmatprep.subr.bf16.mxu1 %v1267_v37  ;;  %v146_v61 = vsel %vm143_vm0, %v139_v53, %v140_v57  ;;  %v164_v2 = vld [vmem:[#allocation2 + $0x60] sm:$0xff]  ;;  %v165_v3 = vld [vmem:[#allocation2 + $0x68] sm:$0xff]  ;;  %v1279_v6 = vpack.c.bf16 %v197_v0, %v196_v63  ;;  %v198_v8 = vld [vmem:[#allocation2 + $0x170] sm:$0xff]  ;;  %v1251_v10 = vpack.c.bf16 %v183_v5, %v182_v4  ;;  %vm1627_vm5 = vcmp.ne.s32.totalorder %v88_v55, 0 }
  0x36   :  { %1238 = vmatpush3.bf16.msra.mxu0 %v1237_v38  ;;  %1144 = vmatprep.mubr.f32.mxu1 %v146_v61  ;;  %v1249_v7 = vpack.c.bf16 %v165_v3, %v164_v2  ;;  %v199_v9 = vld [vmem:[#allocation2 + $0x178] sm:$0xff]  ;;  %v166_v11 = vld [vmem:[#allocation2 + $0x70] sm:$0xff]  ;;  %v421_v15 = vld [vmem:[#allocation5 + $0x80] sm:$0xff]  ;;  %v127_v38 = vrot.slane %v1561_v52, 7 }
  0x37   :  { %1240 = vmatprep.subr.bf16.mxu0 %v1239_v41  ;;  %v167_v12 = vld [vmem:[#allocation2 + $0x78] sm:$0xff]  ;;  %v422_v16 = vld [vmem:[#allocation5 + $0x88] sm:$0xff]  ;;  %v1283_v17 = vpack.c.bf16 %v199_v9, %v198_v8  ;;  %v1581_v18 = vld [vmem:[%s1768_s0 + $0x10] sm:$0xff] }
  0x38   :  { %1270 = vmatpush3.bf16.msra.mxu1 %v1267_v37  ;;  %v1575_v13 = vld [vmem:[%s1768_s0 + $0x18] sm:$0xff]  ;;  %v1253_v19 = vpack.c.bf16 %v167_v12, %v166_v11  ;;  %v437_v23 = vld [vmem:[#allocation5 + $0x100] sm:$0xff]  ;;  %v438_v24 = vld [vmem:[#allocation5 + $0x108] sm:$0xff]  ;;  %v1287_v25 = vpack.c.bf16 %v422_v16, %v421_v15  ;;  %v141_v29 = vrot.slane %v1581_v18, 1  ;;  %v128_v56 = vrot.slane %v1581_v18, 7 }
  0x39   :  { %1272 = vmatprep.subr.bf16.mxu1 %v1271_v47  ;;  %v129_v22 = vrot.slane %v1575_v13, 7  ;;  %v405_v26 = vld [vmem:[#allocation5] sm:$0xff]  ;;  %v406_v27 = vld [vmem:[#allocation5 + $0x8] sm:$0xff]  ;;  %v423_v31 = vld [vmem:[#allocation5 + $0x90] sm:$0xff]  ;;  %v142_v34 = vrot.slane %v1575_v13, 1  ;;  %v1319_v35 = vpack.c.bf16 %v438_v24, %v437_v23 }
  0x3a   :  { %1242 = vmatpush3.bf16.msra.mxu0 %v1241_v49  ;;  %v424_v32 = vld [vmem:[#allocation5 + $0x98] sm:$0xff]  ;;  %v439_v39 = vld [vmem:[#allocation5 + $0x110] sm:$0xff]  ;;  %v1289_v41 = vpack.c.bf16 %v406_v27, %v405_v26  ;;  %v95_v49 = vand.u32 15, %v69_v30  ;;  %v441_v58 = vld [vmem:[#allocation5 + $0x120] sm:$0xff]  ;;  %v132_v0 = vsel %vm130_vm1, %v127_v38, %v128_v56 }
  0x3b   :  { %1244 = vmatprep.subr.bf16.mxu0 %v1243_v54  ;;  %v134_v37 = vsel %vm130_vm1, %v129_v22, %v126_v20  ;;  %v440_v40 = vld [vmem:[#allocation5 + $0x118] sm:$0xff]  ;;  %v1291_v42 = vpack.c.bf16 %v424_v32, %v423_v31  ;;  %v407_v43 = vld [vmem:[#allocation5 + $0x10] sm:$0xff]  ;;  %v144_v50 = vsel %vm143_vm0, %v141_v29, %v142_v34  ;;  %v133_v54 = vsel %vm130_vm1, %v126_v20, %v127_v38  ;;  %v426_v2 = vld [vmem:[#allocation5 + $0xa8] sm:$0xff] }
  0x3c   :  { %1274 = vmatpush3.bf16.msra.mxu1 %v1271_v47  ;;  %v408_v44 = vld [vmem:[#allocation5 + $0x18] sm:$0xff]  ;;  %v145_v47 = vsel %vm143_vm0, %v140_v57, %v141_v29  ;;  %v1323_v51 = vpack.c.bf16 %v440_v40, %v439_v39  ;;  %v442_v57 = vld [vmem:[#allocation5 + $0x128] sm:$0xff]  ;;  %vm1618_vm4 = vcmp.ne.s32.totalorder %v95_v49, 15  ;;  %v147_v61 = vsel %vm143_vm0, %v142_v34, %v139_v53  ;;  %v443_v3 = vld [vmem:[#allocation5 + $0x130] sm:$0xff] }
  0x3d   :  { %1276 = vmatprep.subr.bf16.mxu1 %v1275_v60  ;;  %v1293_v59 = vpack.c.bf16 %v408_v44, %v407_v43  ;;  %v131_v53 = vsel %vm130_vm1, %v128_v56, %v129_v22  ;;  %v444_v5 = vld [vmem:[#allocation5 + $0x138] sm:$0xff]  ;;  %v445_v12 = vld [vmem:[#allocation5 + $0x140] sm:$0xff]  ;;  %v446_v15 = vld [vmem:[#allocation5 + $0x148] sm:$0xff] }
  0x3e   :  { %1246 = vmatpush3.bf16.msra.mxu0 %v1245_v62  ;;  %v1327_v62 = vpack.c.bf16 %v442_v57, %v441_v58  ;;  %v1331_v8 = vpack.c.bf16 %v444_v5, %v443_v3  ;;  %v428_v11 = vld [vmem:[#allocation5 + $0xb8] sm:$0xff]  ;;  %v411_v16 = vld [vmem:[#allocation5 + $0x30] sm:$0xff]  ;;  %v429_v21 = vld [vmem:[#allocation5 + $0xc0] sm:$0xff] }
  0x3f   :  { %1248 = vmatprep.subr.bf16.mxu0 %v1247_v1  ;;  %v425_v1 = vld [vmem:[#allocation5 + $0xa0] sm:$0xff]  ;;  %v430_v22 = vld [vmem:[#allocation5 + $0xc8] sm:$0xff]  ;;  %v447_v23 = vld [vmem:[#allocation5 + $0x150] sm:$0xff] }
  0x40   :  { %1278 = vmatpush3.bf16.msra.mxu1 %v1275_v60  ;;  %v1295_v4 = vpack.c.bf16 %v426_v2, %v425_v1  ;;  %v1303_v24 = vpack.c.bf16 %v430_v22, %v429_v21  ;;  %v413_v26 = vld [vmem:[#allocation5 + $0x40] sm:$0xff]  ;;  %v414_v27 = vld [vmem:[#allocation5 + $0x48] sm:$0xff]  ;;  %v431_v30 = vld [vmem:[#allocation5 + $0xd0] sm:$0xff] }
  0x41   :  { %1280 = vmatprep.subr.bf16.mxu1 %v1279_v6  ;;  %v1305_v29 = vpack.c.bf16 %v414_v27, %v413_v26  ;;  %v432_v31 = vld [vmem:[#allocation5 + $0xd8] sm:$0xff]  ;;  %v449_v32 = vld [vmem:[#allocation5 + $0x160] sm:$0xff]  ;;  %v450_v34 = vld [vmem:[#allocation5 + $0x168] sm:$0xff] }
  0x42   :  { %1250 = vmatpush3.bf16.msra.mxu0 %v1249_v7  ;;  %v410_v7 = vld [vmem:[#allocation5 + $0x28] sm:$0xff]  ;;  %v1307_v33 = vpack.c.bf16 %v432_v31, %v431_v30  ;;  %v1343_v38 = vpack.c.bf16 %v450_v34, %v449_v32  ;;  %v433_v40 = vld [vmem:[#allocation5 + $0xe0] sm:$0xff]  ;;  %v452_v44 = vld [vmem:[#allocation5 + $0x178] sm:$0xff] }
  0x43   :  { %1252 = vmatprep.subr.bf16.mxu0 %v1251_v10  ;;  %v427_v10 = vld [vmem:[#allocation5 + $0xb0] sm:$0xff]  ;;  %v418_v49 = vld [vmem:[#allocation5 + $0x68] sm:$0xff]  ;;  %v436_v55 = vld [vmem:[#allocation5 + $0xf8] sm:$0xff] }
  0x44   :  { %1282 = vmatpush3.bf16.msra.mxu1 %v1279_v6  ;;  %v409_v6 = vld [vmem:[#allocation5 + $0x20] sm:$0xff]  ;;  %v1299_v14 = vpack.c.bf16 %v428_v11, %v427_v10  ;;  %v419_v58 = vld [vmem:[#allocation5 + $0x70] sm:$0xff]  ;;  %v420_v57 = vld [vmem:[#allocation5 + $0x78] sm:$0xff] }
  0x45   :  { %1284 = vmatprep.subr.bf16.mxu1 %v1283_v17  ;;  %v1297_v9 = vpack.c.bf16 %v410_v7, %v409_v6  ;;  %v648_v45 = vld [vmem:[%s1773_s5] sm:$0xff]  ;;  %v649_v36 = vld [vmem:[%s1773_s5 + $0x8] sm:$0xff]  ;;  %v650_v60 = vld [vmem:[%s1773_s5 + $0x10] sm:$0xff] }
  0x46   :  { %1254 = vmatpush3.bf16.msra.mxu0 %v1253_v19  ;;  %v412_v19 = vld [vmem:[#allocation5 + $0x38] sm:$0xff] }
  0x47   :  { %1288 = vmatprep.subr.bf16.mxu0 %v1287_v25  ;;  %v1301_v20 = vpack.c.bf16 %v412_v19, %v411_v16  ;;  %v448_v25 = vld [vmem:[#allocation5 + $0x158] sm:$0xff] }
  0x48   :  { %1286 = vmatpush3.bf16.msra.mxu1 %v1283_v17  ;;  %v1335_v17 = vpack.c.bf16 %v446_v15, %v445_v12  ;;  %v1339_v28 = vpack.c.bf16 %v448_v25, %v447_v23  ;;  %v651_v63 = vld [vmem:[%s1773_s5 + $0x18] sm:$0xff] }
  0x49   :  { %953 = vmatmul.mubr.msk.f32.vlgmr.msra.gmra.mrb[0].mxu0 %vm1591_vm2, %v134_v37  ;;  %1320 = vmatprep.subr.bf16.mxu1 %v1319_v35  ;;  %v416_v37 = vld [vmem:[#allocation5 + $0x58] sm:$0xff] }
  0x4a   :  { %276 = vmatprep.mubr.f32.mxu0 %v1561_v52  ;;  %1290 = vmatpush3.bf16.msra.mxu0 %v1289_v41  ;;  %v434_v41 = vld [vmem:[#allocation5 + $0xe8] sm:$0xff] }
  0x4b   :  { %1145 = vmatmul.mubr.msk.f32.vlgmr.msra.gmra.mrb[0].mxu1 %vm1600_vm3, %v145_v47  ;;  %1292 = vmatprep.subr.bf16.mxu0 %v1291_v42  ;;  %v451_v42 = vld [vmem:[#allocation5 + $0x170] sm:$0xff]  ;;  %v1311_v43 = vpack.c.bf16 %v434_v41, %v433_v40  ;;  %v417_v47 = vld [vmem:[#allocation5 + $0x60] sm:$0xff] }
  0x4c   :  { %1147 = vmatprep.mubr.f32.mxu1 %v144_v50  ;;  %1322 = vmatpush3.bf16.msra.mxu1 %v1319_v35  ;;  %v415_v35 = vld [vmem:[#allocation5 + $0x50] sm:$0xff]  ;;  %v1347_v50 = vpack.c.bf16 %v452_v44, %v451_v42 }
  0x4d   :  { %277 = vmatmul.mubr.f32.gmra.mrb[2].mxu0 %v133_v54  ;;  %1324 = vmatprep.subr.bf16.mxu1 %v1323_v51  ;;  %v1309_v39 = vpack.c.bf16 %v416_v37, %v415_v35  ;;  %v435_v54 = vld [vmem:[#allocation5 + $0xf0] sm:$0xff] }
  0x4e   :  { %281 = vmatprep.mubr.f32.mxu0 %v1581_v18  ;;  %1294 = vmatpush3.bf16.msra.mxu0 %v1293_v59  ;;  %v1315_v56 = vpack.c.bf16 %v436_v55, %v435_v54  ;;  %v1317_v59 = vpack.c.bf16 %v420_v57, %v419_v58  ;;  %v653_v54 = vld [vmem:[%s1773_s5 + $0x28] sm:$0xff]  ;;  %v655_v58 = vld [vmem:[%s1773_s5 + $0x38] sm:$0xff] }
  0x4f   :  { %1148 = vmatmul.mubr.msk.f32.gmra.mrb[2].mxu1 %vm1618_vm4, %v147_v61  ;;  %1296 = vmatprep.subr.bf16.mxu0 %v1295_v4 }
  0x50   :  { %1326 = vmatpush3.bf16.msra.mxu1 %v1323_v51  ;;  %v1313_v51 = vpack.c.bf16 %v418_v49, %v417_v47  ;;  %v1352_v47 = vpack.c.bf16 %v649_v36, %v648_v45  ;;  %v1465_v49 = vmov 0.0|0.0  }
  0x51   :  { %954 = vmatmul.mubr.msk.f32.gmra.mrb[4].mxu0 %vm1627_vm5, %v132_v0  ;;  %1328 = vmatprep.subr.bf16.mxu1 %v1327_v62  ;;  %v952_v0 = vld [vmem:[%s1770_s2] ss:$0 sm:$0xff] }
  0x52   :  { %286 = vmatprep.mubr.f32.mxu0 %v1575_v13  ;;  %1298 = vmatpush3.bf16.msra.mxu0 %v1297_v9 }
  0x53   :  { %1300 = vmatprep.subr.bf16.mxu0 %v1299_v14 }
  0x54   :  { %1330 = vmatpush3.bf16.msra.mxu1 %v1327_v62 }
  0x55   :  { %287 = vmatmul.mubr.f32.gmra.mrb[6].mxu0 %v131_v53  ;;  %1332 = vmatprep.subr.bf16.mxu1 %v1331_v8 }
  0x56   :  { %1302 = vmatpush3.bf16.msra.mxu0 %v1301_v20 }
  0x57   :  { %1304 = vmatprep.subr.bf16.mxu0 %v1303_v24 }
  0x58   :  { %1334 = vmatpush3.bf16.msra.mxu1 %v1331_v8 }
  0x59   :  { %1336 = vmatprep.subr.bf16.mxu1 %v1335_v17 }
  0x5a   :  { %1306 = vmatpush3.bf16.msra.mxu0 %v1305_v29 }
  0x5b   :  { %1308 = vmatprep.subr.bf16.mxu0 %v1307_v33 }
  0x5c   :  { %1338 = vmatpush3.bf16.msra.mxu1 %v1335_v17 }
  0x5d   :  { %1340 = vmatprep.subr.bf16.mxu1 %v1339_v28 }
  0x5e   :  { %1310 = vmatpush3.bf16.msra.mxu0 %v1309_v39 }
  0x5f   :  { %1312 = vmatprep.subr.bf16.mxu0 %v1311_v43 }
  0x60   :  { %1342 = vmatpush3.bf16.msra.mxu1 %v1339_v28 }
  0x61   :  { %1344 = vmatprep.subr.bf16.mxu1 %v1343_v38 }
  0x62   :  { %1314 = vmatpush3.bf16.msra.mxu0 %v1313_v51  ;;  %v652_v51 = vld [vmem:[%s1773_s5 + $0x20] sm:$0xff] }
  0x63   :  { %1316 = vmatprep.subr.bf16.mxu0 %v1315_v56  ;;  %v1358_v55 = vpack.c.bf16 %v653_v54, %v652_v51  ;;  %v654_v56 = vld [vmem:[%s1773_s5 + $0x30] sm:$0xff] }
  0x64   :  { %1346 = vmatpush3.bf16.msra.mxu1 %v1343_v38  ;;  %v1361_v57 = vpack.c.bf16 %v655_v58, %v654_v56 }
  0x65   :  { %1348 = vmatprep.subr.bf16.mxu1 %v1347_v50 }
  0x66   :  { %1318 = vmatpush3.bf16.msra.mxu0 %v1317_v59  ;;  %v656_v59 = vld [vmem:[%s1773_s5 + $0x40] sm:$0xff] }
  0x67   :  { %1351 = vmatprep.subr.bf16.mxu0 %v1465_v49 }
  0x68   :  { %1350 = vmatpush3.bf16.msra.mxu1 %v1347_v50  ;;  %v1355_v50 = vpack.c.bf16 %v651_v63, %v650_v60 }
 0x11c   :  { %v999_v61 = vpop.f32.mrb[0].mxu0 }
 0x11d   :  { %v1000_v62 = vpop.f32.mrb[1].mxu0 }
 0x11e   :  { %v1001_v53 = vadd.f32 %v1000_v62, %v999_v61  ;;  %v1146_v1 = vpop.f32.mrb[0].mxu1  ;;  %v657_v61 = vld [vmem:[%s1773_s5 + $0x48] sm:$0xff] }
 0x11f   :  { %v358_v2 = vpop.f32.mrb[1].mxu1  ;;  %v1364_v62 = vpack.c.bf16 %v657_v61, %v656_v59  ;;  %v962_v59 = vld [vmem:[%s1774_s6] ss:$0 sm:$0xff]  ;;  %s1469_s6 = smov [#allocation7]  }
 0x120   :  { %v1002_v3 = vpop.f32.mrb[2].mxu0  ;;  %v274_v4 = vadd.f32 %v1001_v53, %v952_v0  ;;  %v659_v53 = vld [vmem:[%s1773_s5 + $0x58] sm:$0xff] }
 0x121   :  { %v1003_v5 = vpop.f32.mrb[3].mxu0 }
 0x122   :  { %v1004_v6 = vadd.f32 %v1003_v5, %v1002_v3  ;;  %v359_v7 = vadd.f32 %v358_v2, %v274_v4  ;;  %v1149_v8 = vpop.f32.mrb[2].mxu1  ;;  %v660_v2 = vld [vmem:[%s1773_s5 + $0x60] sm:$0xff]  ;;  %v661_v3 = vld [vmem:[%s1773_s5 + $0x68] sm:$0xff]  ;;  %v662_v5 = vld [vmem:[%s1773_s5 + $0x70] sm:$0xff] }
 0x123   :  { %v368_v9 = vpop.f32.mrb[3].mxu1  ;;  %v1370_v4 = vpack.c.bf16 %v661_v3, %v660_v2  ;;  %v748_v2 = vld [vmem:[%s1776_s8] sm:$0x3]  ;;  %s939_s8 = sshll.u32 %s1469_s6, 4  ;;  %s940_s8 = int_to_ptr.vmem [resolvable:$true] %s939_s8 }
 0x124   :  { %v279_v10 = vadd.f32 %v1004_v6, %v952_v0  ;;  %v377_v11 = vmax.f32 %v359_v7, 0.0  ;;  %v1005_v12 = vpop.f32.mrb[4].mxu0  ;;  %v663_v6 = vld [vmem:[%s1773_s5 + $0x78] sm:$0xff]  ;;  %s1433_s13 = scalar_lea.vmem %s940_s8, 512  ;;  %p1438_p3 = scmp.lt.s32.totalorder %s940_s8, %s940_s8 }
 0x125   :  { %v1006_v14 = vpop.f32.mrb[5].mxu0  ;;  %v1373_v7 = vpack.c.bf16 %v663_v6, %v662_v5  ;;  %p1434_p2 = scmp.ne.s32.totalorder %s940_s8, %s1433_s13  ;;  %p1439_p4 = scmp.lt.s32.totalorder %s1433_s13, %s1433_s13 }
 0x126   :  { %v364_v15 = vadd.f32 %v1146_v1, %v279_v10  ;;  %v1007_v16 = vadd.f32 %v1006_v14, %v1005_v12  ;;  %524 = vmatprep.mubr.f32.mxu0 %v377_v11  ;;  %v381_v21 = vrot.slane %v377_v11, 7  ;;  %v393_v22 = vrot.slane %v377_v11, 1 }
 0x127   :  { %p1440_p5 = por %p1439_p4, %p1438_p3 }
 0x128   :  { %v378_v17 = vmax.f32 %v364_v15, 0.0  ;;  %v1008_v19 = vpop.f32.mrb[6].mxu0  ;;  %v284_v20 = vadd.f32 %v1007_v16, %v952_v0  ;;  %v957_v15 = vld [vmem:[%s1772_s4] ss:$0 sm:$0xff] }
 0x129   :  { %v1009_v23 = vpop.f32.mrb[7].mxu0  ;;  %p1441_p6 = pnand %p1440_p5, %p1434_p2 }
 0x12a   :  { %v1010_v24 = vadd.f32 %v1009_v23, %v1008_v19  ;;  %v369_v25 = vadd.f32 %v368_v9, %v284_v20  ;;  %v394_v26 = vrot.slane %v378_v17, 1  ;;  %v382_v27 = vrot.slane %v378_v17, 7  ;;  %v747_v9 = vld [vmem:[%s1775_s7] sm:$0xff] }
 0x12b   :  { %v761_v10 = vcombine.high %v747_v9, %v747_v9 }
 0x12c   :  { %v289_v28 = vadd.f32 %v1010_v24, %v952_v0  ;;  %v379_v29 = vmax.f32 %v369_v25, 0.0  ;;  %v399_v30 = vsel %vm143_vm0, %v393_v22, %v394_v26  ;;  %v387_v31 = vsel %vm130_vm1, %v381_v21, %v382_v27  ;;  %v658_v0 = vld [vmem:[%s1773_s5 + $0x50] sm:$0xff] }
 0x12d   :  { %1182 = vmatprep.mubr.f32.mxu1 %v399_v30  ;;  %v1367_v1 = vpack.c.bf16 %v659_v53, %v658_v0  ;;  %963 = vmatprep.subr.msk.mxu1 %vm766_vm7, %v761_v10  ;;  %v756_v10 = vsub.s32 1, %v1550_v46 }
 0x12e   :  { %v374_v32 = vadd.f32 %v1149_v8, %v289_v28  ;;  %v383_v33 = vrot.slane %v379_v29, 7  ;;  %v395_v34 = vrot.slane %v379_v29, 1  ;;  %v1467_v8 = vmov 0.0  }
 0x130   :  { %v380_v35 = vmax.f32 %v374_v32, 0.0  ;;  %v398_v37 = vsel %vm143_vm0, %v394_v26, %v395_v34  ;;  %v386_v38 = vsel %vm130_vm1, %v382_v27, %v383_v33 }
 0x131   :  { %1183 = vmatmul.mubr.msk.f32.vlgmr.msra.gmra.mrb[4].mxu1 %vm1600_vm3, %v398_v37 }
 0x132   :  { %v384_v39 = vrot.slane %v380_v35, 7  ;;  %v396_v40 = vrot.slane %v380_v35, 1  ;;  %964 = vmatpush1.msk.msra.mxu1 %vm766_vm7, %v747_v9 }
 0x134   :  { %v388_v41 = vsel %vm130_vm1, %v384_v39, %v381_v21  ;;  %v397_v42 = vsel %vm143_vm0, %v395_v34, %v396_v40  ;;  %v400_v43 = vsel %vm143_vm0, %v396_v40, %v393_v22  ;;  %v385_v44 = vsel %vm130_vm1, %v383_v33, %v384_v39 }
 0x135   :  { %958 = vmatmul.mubr.msk.f32.vlgmr.msra.gmra.mrb[8].mxu0 %vm1591_vm2, %v388_v41  ;;  %1185 = vmatprep.mubr.f32.mxu1 %v397_v42 }
 0x136   :  { %529 = vmatprep.mubr.f32.mxu0 %v378_v17  ;;  %1186 = vmatmul.mubr.msk.f32.gmra.mrb[6].mxu1 %vm1618_vm4, %v400_v43 }
 0x137   :  { %1353 = vmatpush3.bf16.msra.mxu0 %v1352_v47  ;;  %835 = vmatprep.mubr.f32.mxu1 %v1467_v8 }
 0x138   :  { %1354 = vmatprep.subr.bf16.mxu0 %v1465_v49 }
 0x139   :  { %530 = vmatmul.mubr.f32.gmra.mrb[10].mxu0 %v387_v31 }
 0x13a   :  { %534 = vmatprep.mubr.f32.mxu0 %v379_v29 }
 0x13b   :  { %1356 = vmatpush3.bf16.msra.mxu0 %v1355_v50 }
 0x13c   :  { %1357 = vmatprep.subr.bf16.mxu0 %v1465_v49 }
 0x13d   :  { %959 = vmatmul.mubr.msk.f32.gmra.mrb[12].mxu0 %vm1627_vm5, %v386_v38 }
 0x13e   :  { %539 = vmatprep.mubr.f32.mxu0 %v380_v35 }
 0x13f   :  { %1359 = vmatpush3.bf16.msra.mxu0 %v1358_v55 }
 0x140   :  { %1360 = vmatprep.subr.bf16.mxu0 %v1465_v49 }
 0x141   :  { %540 = vmatmul.mubr.f32.gmra.mrb[14].mxu0 %v385_v44 }
 0x142   :  { %1220 = vmatprep.mubr.msk.f32.mxu0 %vm1466_vm6, %v1467_v8  ;;  %v1468_v8 = vmov 1966171168  }
 0x143   :  { %1362 = vmatpush3.bf16.msra.mxu0 %v1361_v57  ;;  %v850_v9 = vunpack.c.l.s4 %v1468_v8 }
 0x144   :  { %1363 = vmatprep.subr.bf16.mxu0 %v1465_v49 }
 0x147   :  { %1365 = vmatpush3.bf16.msra.mxu0 %v1364_v62 }
 0x148   :  { %1366 = vmatprep.subr.bf16.mxu0 %v1465_v49 }
 0x14b   :  { %1368 = vmatpush3.bf16.msra.mxu0 %v1367_v1  ;;  %v752_v1 = vsub.s32 0, %v1550_v46 }
 0x14c   :  { %1369 = vmatprep.subr.bf16.mxu0 %v1465_v49 }
 0x14d   :  { %v753_v3 = vrot.slane %v748_v2, %v752_v1 }
 0x14f   :  { %1371 = vmatpush3.bf16.msra.mxu0 %v1370_v4 }
 0x150   :  { %1372 = vmatprep.subr.bf16.mxu0 %v1465_v49 }
 0x153   :  { %1374 = vmatpush3.bf16.msra.mxu0 %v1373_v7 }
 0x204   :  { %v1184_v11 = vpop.f32.mrb[4].mxu1 }
 0x205   :  { %v611_v12 = vpop.f32.mrb[5].mxu1 }
 0x208   :  { %v1063_v14 = vpop.f32.mrb[8].mxu0 }
 0x209   :  { %v1064_v16 = vpop.f32.mrb[9].mxu0  ;;  %v1187_v17 = vpop.f32.mrb[6].mxu1 }
 0x20a   :  { %v1065_v19 = vadd.f32 %v1064_v16, %v1063_v14  ;;  %v621_v20 = vpop.f32.mrb[7].mxu1  ;;  %v851_v14 = vunpack.c.0.s8 %v850_v9 }
 0x20c   :  { %v527_v21 = vadd.f32 %v1065_v19, %v957_v15  ;;  %v1066_v22 = vpop.f32.mrb[10].mxu0  ;;  %v854_v16 = vsub.s32 %v851_v14, %v1550_v46 }
 0x20d   :  { %v1067_v23 = vpop.f32.mrb[11].mxu0 }
 0x20e   :  { %v1723_v24 = vadd.f32 %v611_v12, %v527_v21  ;;  %v1068_v25 = vadd.f32 %v1067_v23, %v1066_v22 }
 0x210   :  { %v532_v26 = vadd.f32 %v1068_v25, %v957_v15  ;;  %v1069_v27 = vpop.f32.mrb[12].mxu0  ;;  %v630_v31 = vmax.f32 %v1723_v24, 0.0 }
 0x211   :  { %v1070_v28 = vpop.f32.mrb[13].mxu0 }
 0x212   :  { %v1725_v29 = vadd.f32 %v1184_v11, %v532_v26  ;;  %v1071_v30 = vadd.f32 %v1070_v28, %v1069_v27 }
 0x214   :  { %v631_v32 = vmax.f32 %v1725_v29, 0.0  ;;  %v537_v33 = vadd.f32 %v1071_v30, %v957_v15  ;;  %v1072_v34 = vpop.f32.mrb[14].mxu0 }
 0x215   :  { %v1073_v35 = vpop.f32.mrb[15].mxu0 }
 0x216   :  { %v634_v37 = vadd.f32 %v631_v32, %v630_v31  ;;  %v1733_v38 = vadd.f32 %v621_v20, %v537_v33  ;;  %v1074_v39 = vadd.f32 %v1073_v35, %v1072_v34 }
 0x218   :  { %v635_v40 = vrot.slane %v634_v37, 4  ;;  %v542_v41 = vadd.f32 %v1074_v39, %v957_v15  ;;  %v632_v44 = vmax.f32 %v1733_v38, 0.0  ;;  %v757_v15 = vrot.slane %v748_v2, %v756_v10 }
 0x21a   :  { %v636_v42 = vadd.f32 %v635_v40, %v634_v37  ;;  %v627_v43 = vadd.f32 %v1187_v17, %v542_v41 }
 0x21c   :  { %v633_v45 = vmax.f32 %v627_v43, 0.0  ;;  %v637_v36 = vrot.slane %v636_v42, 2 }
 0x21e   :  { %v641_v47 = vadd.f32 %v633_v45, %v632_v44  ;;  %v638_v60 = vadd.f32 %v637_v36, %v636_v42 }
 0x220   :  { %v642_v49 = vrot.slane %v641_v47, 4  ;;  %v639_v54 = vrot.slane %v638_v60, 1 }
 0x222   :  { %v643_v63 = vadd.f32 %v642_v49, %v641_v47  ;;  %v640_v56 = vadd.f32 %v639_v54, %v638_v60 }
 0x224   :  { %v644_v50 = vrot.slane %v643_v63, 2 }
 0x226   :  { %v645_v51 = vadd.f32 %v644_v50, %v643_v63 }
 0x228   :  { %v646_v55 = vrot.slane %v645_v51, 1 }
 0x22a   :  { %v647_v58 = vadd.f32 %v646_v55, %v645_v51 }
 0x22c   :  { %v674_v57 = vsel %vm673_vm8, %v647_v58, %v640_v56 }
 0x22d   :  { %1221 = vmatmul.mubr.f32.vlgmr.msra.gmra.mrb[16].mxu0 %v674_v57 }
 0x300   :  { %v742_v61 = vpop.f32.mrb[16].mxu0 }
 0x301   :  { %v743_v62 = vadd.f32 %v962_v59, %v742_v61  ;;  %v1222_v0 = vpop.f32.mrb[17].mxu0 }
 0x303   :  { %v746_v53 = vmax.f32 %v743_v62, 0.0 }
 0x305   :  { %965 = vmatmul.mubr.msk.f32.vlgmr.msra.gmra.mrb[8].mxu1 %vm762_vm9, %v746_v53 }
 0x3d8   :  { %v837_v4 = vpop.f32.mrb[8].mxu1 }
 0x3d9   :  { %v838_v5 = vadd.f32 %v837_v4, %v753_v3  ;;  %v839_v6 = vpop.f32.mrb[9].mxu1 }
 0x3da   :  { %v840_v17 = vadd.f32 %v839_v6, %v757_v15 }
 0x3db   :  { %v966_v7 = vmul.f32 -1.442695, %v838_v5 }
 0x3dc   :  { %v892_v19 = vrot.slane %v840_v17, %v854_v16 }
 0x3dd   :  { %1385 = vpow2.f32 %v966_v7 }
 0x3de   :  { %v893_v21 = vcombine.high %v892_v19, %v892_v19  ;;  %v900_v26 = vrot.slane %v892_v19, %v854_v16 }
 0x3e0   :  { %v907_v27 = vrot.slane %v893_v21, %v854_v16  ;;  %v911_v37 = vrot.slane %v900_v26, %v752_v1 }
 0x3e2   :  { %v915_v46 = vrot.slane %v907_v27, %v752_v1 }
 0x3e7   :  { %v1386_v11 = vpop.eup %1385 }
 0x3e8   :  { %v845_v12 = vadd.f32 1.0, %v1386_v11 }
 0x3ea   :  { %1387 = vrcp.f32 %v845_v12 }
 0x3f4   :  { %v1388_v20 = vpop.eup %1387 }
 0x3f5   :  { %v855_v22 = vrot.slane %v1388_v20, %v854_v16 }
 0x3f7   :  { %v856_v23 = vcombine.high %v855_v22, %v855_v22  ;;  %v863_v25 = vrot.slane %v855_v22, %v854_v16 }
 0x3f9   :  { %v870_v28 = vrot.slane %v856_v23, %v854_v16  ;;  %v874_v30 = vrot.slane %v863_v25, %v752_v1 }
 0x3fb   :  { %v878_v33 = vrot.slane %v870_v28, %v752_v1  ;;  %v881_v34 = vmul.f32 %v874_v30, %v630_v31  ;;  %v882_v35 = vmul.f32 %v874_v30, %v631_v32 }
 0x3fd   :  { %v883_v38 = vmul.f32 %v878_v33, %v632_v44  ;;  %v884_v39 = vmul.f32 %v878_v33, %v633_v45  ;;  %v918_v40 = vadd.f32 %v911_v37, %v881_v34  ;;  %v919_v41 = vadd.f32 %v911_v37, %v882_v35 }
 0x3ff   :  { %v920_v42 = vadd.f32 %v915_v46, %v883_v38  ;;  %v921_v43 = vadd.f32 %v915_v46, %v884_v39  ;;  %v922_v36 = vadd.f32 %v918_v40, %v1555_v48  ;;  %v923_v47 = vadd.f32 %v919_v41, %v1561_v52 }
 0x401   :  { %v924_v24 = vadd.f32 %v920_v42, %v1581_v18  ;;  %v925_v31 = vadd.f32 %v921_v43, %v1575_v13  ;;  %v926_v29 = vmax.f32 %v922_v36, 0.0  ;;  %v927_v32 = vmax.f32 %v923_v47, 0.0 }
 0x403   :  { %v928_v49 = vmax.f32 %v924_v24, 0.0  ;;  %v929_v60 = vmax.f32 %v925_v31, 0.0  ;;  %930 = vst [vmem:[#allocation7] sm:$0xff] %v926_v29  ;;  %931 = vst [vmem:[#allocation7 + $0x8] sm:$0xff] %v927_v32 }
 0x405   :  { %932 = vst [vmem:[#allocation7 + $0x10] sm:$0xff] %v928_v49  ;;  %933 = vst [vmem:[#allocation7 + $0x18] sm:$0xff] %v929_v60 }
 0x406   :  { %1444 = shalt.err (!%p1441_p6)
}
 0x407   :  { %s1445_s16 = scalar_lea.hbm %s1777_s9, 512 }
 0x408   :  { %p1446_p7 = scmp.ne.s32.totalorder %s1777_s9, %s1445_s16  ;;  %p1449_p8 = scmp.lt.u32.totalorder %s1445_s16, %s1777_s9 }
 0x40a   :  { %p1451_p9 = pnand %p1449_p8, %p1446_p7 }
 0x40c   :  { %1454 = shalt.err (!%p1451_p9)
}
 0x40d   :  { %945 = dma.vmem_to_hbm [thread:$0]  %s940_s8, 512, %s1777_s9, [#allocation4], %s1462_s19, %s1462_s19, %s1463_s20  }
 0x40e   :  { %1459 = dma.done.wait [#allocation4], 512  }
 0x40f   :  { %1460 = vsyncadd [#allocation4], 4294966784 }
 0x410   :  { %949 = vsyncpa [#allocation3], 1 }
 0x411   :  { %950 = vsyncpa [#allocation6], 1 }
 0x412   :  { %951 = vsyncpa [#allocation4], 1 }

</bundles_post_ra>
